<compile_context>
chip_gen: v7x
topology: tpu7x:2x2x1
jax: 0.10.0
libtpu: 0.0.40
codegen_flags: <defaults>
</compile_context>

<pallas_src>
import functools

import jax
import jax.numpy as jnp
from jax.experimental import pallas as pl
from jax.experimental.pallas import tpu as pltpu


# ----------------------------------------------------------------------------
# Kernel bodies
# ----------------------------------------------------------------------------
def _encode(x_f32, w, b, cdt):
    """Linear + bias + ReLU; bf16 MXU inputs, f32 accumulation, bf16 result."""
    y = jnp.dot(x_f32.astype(cdt), w, preferred_element_type=jnp.float32) + b
    return jnp.maximum(y, 0.0).astype(cdt)      # ReLU fused with the downcast


def _value_tail(sf, af, w1s_ref, w1a_ref, b1_ref, w2_ref, b2_ref, w3_ref,
                b3_ref, out_ref):
    f32 = jnp.float32
    cdt = w2_ref.dtype
    # value_network[0]: torch.cat folded into two matmuls.
    h1 = jnp.maximum(
        jnp.dot(sf, w1s_ref[...], preferred_element_type=f32)
        + jnp.dot(af, w1a_ref[...], preferred_element_type=f32)
        + b1_ref[...], 0.0).astype(cdt)
    # value_network[2]
    h2 = jnp.maximum(
        jnp.dot(h1, w2_ref[...], preferred_element_type=f32) + b2_ref[...],
        0.0).astype(cdt)
    # value_network[4] (scalar head), emitted lane-dense:
    # (1, hidden) contracted with (tb, hidden) over hidden -> (1, tb) row.
    v = jnp.einsum("oh,bh->ob", w3_ref[...], h2,
                   preferred_element_type=f32) + b3_ref[0, 0]
    out_ref[...] = v[None].astype(out_ref.dtype)          # (1, 1, tb) block


def _critic_kernel_continuous(state_ref, action_ref,
                              ws_ref, bs_ref, wa_ref, ba_ref,
                              w1s_ref, w1a_ref, b1_ref,
                              w2_ref, b2_ref, w3_ref,
                              b3_ref, out_ref):
    cdt = ws_ref.dtype
    sf = _encode(state_ref[...], ws_ref[...], bs_ref[...], cdt)
    af = _encode(action_ref[...], wa_ref[...], ba_ref[...], cdt)
    _value_tail(sf, af, w1s_ref, w1a_ref, b1_ref, w2_ref, b2_ref, w3_ref,
                b3_ref, out_ref)


def _critic_kernel_discrete(state_ref, act_feat_ref,
                            ws_ref, bs_ref,
                            w1s_ref, w1a_ref, b1_ref,
                            w2_ref, b2_ref, w3_ref,
                            b3_ref, out_ref):
    cdt = ws_ref.dtype
    sf = _encode(state_ref[...], ws_ref[...], bs_ref[...], cdt)
    # Embedding rows were gathered (f32) in the wrapper; ReLU + downcast here.
    af = jnp.maximum(act_feat_ref[...], 0.0).astype(cdt)
    _value_tail(sf, af, w1s_ref, w1a_ref, b1_ref, w2_ref, b2_ref, w3_ref,
                b3_ref, out_ref)


# ----------------------------------------------------------------------------
# Tiling / VMEM helpers
# ----------------------------------------------------------------------------
def _round_up(x, m):
    return -(-x // m) * m


def _vmem_budget():
    """Generation-aware VMEM budget (bytes) and vmem_limit_bytes."""
    try:
        cap = int(pltpu.get_tpu_info().vmem_capacity_bytes)
    except Exception:
        cap = 64 << 20                              # conservative (v7x) fallback
    limit = min(int(cap * 3 // 4), 100 << 20)       # ~48 MiB v7x, ~96 MiB v5e/v6e
    budget = max(limit - (6 << 20), 8 << 20)        # headroom for compiler scratch
    return budget, limit


def _auto_block_batch(s_dim, a_dim, half, hidden, weight_bytes, budget,
                      max_tile=1024):
    """Largest batch tile whose streamed inputs + intermediates fit the
    per-generation VMEM budget (weights are single-buffered residents)."""
    row_bytes = (6 * (s_dim + a_dim)  # 2x-buffered f32 inputs + in-kernel bf16 cast
                 + 12 * half          # sf/af bf16 + transient f32 pre-ReLU
                 + 16 * hidden        # h1/h2 bf16 + transient f32 pre-ReLU
                 + 8)                 # lane-dense f32 output row (2x buffered)
    avail = max(budget - weight_bytes, 1 << 20)
    tb = int(min(max_tile, avail // row_bytes))
    if tb >= 256:
        return (tb // 256) * 256      # MXU-friendly M tiles on v6e/v7x
    return max(8, (tb // 8) * 8)


def _choose_tile(batch, tb_max):
    """Pick (tile, padded_batch).  Prefer tiles dividing the 8-rounded batch so
    the wrapper never has to jnp.pad the streamed inputs."""
    b8 = _round_up(batch, 8)
    tb_max = max(8, (int(tb_max) // 8) * 8)
    if b8 <= tb_max:
        return b8, b8
    t = tb_max
    while t >= max(8, tb_max // 2):
        if b8 % t == 0:
            return t, b8
        t -= 8
    return tb_max, _round_up(b8, tb_max)


def _pinned(x):
    """Full-array block with a constant index map: DMA'd once, then resident in
    VMEM across every grid step.  Single-buffered (the block never changes)."""
    zeros = (0,) * x.ndim
    idx = lambda i: zeros
    if hasattr(pl, "Buffered"):
        try:
            return pl.BlockSpec(x.shape, idx, pipeline_mode=pl.Buffered(1))
        except TypeError:
            pass
    return pl.BlockSpec(x.shape, idx)


# ----------------------------------------------------------------------------
# Forward pass
# ----------------------------------------------------------------------------
@functools.partial(jax.jit, static_argnames=("continuous", "block_batch"))
def mlp_critic_forward(state, action, params, *, continuous=True,
                       block_batch=None):
    """state: [B, state_dim] f32.
       action: [B, action_dim] f32 (continuous) or [B] int (discrete).
       params: output of prepare_params()."""
    f32 = jnp.float32
    batch = state.shape[0]
    half = params["ws"].shape[1]
    hidden = params["w2"].shape[1]

    # Inputs stay f32; the bf16 downcast happens inside the kernel (VPU).
    state_in = state.reshape(batch, -1).astype(f32)
    if continuous:
        act_in = action.reshape(batch, -1).astype(f32)
        weights = (params["ws"], params["bs"], params["wa"], params["ba"],
                   params["w1s"], params["w1a"], params["b1"],
                   params["w2"], params["b2"], params["w3"])
        kernel = _critic_kernel_continuous
    else:
        # nn.Embedding lookup as a plain-JAX row gather; ReLU is done in-kernel.
        idx = action.reshape(batch).astype(jnp.int32)
        act_in = jnp.take(params["wa_embed"], idx, axis=0).astype(f32)
        weights = (params["ws"], params["bs"],
                   params["w1s"], params["w1a"], params["b1"],
                   params["w2"], params["b2"], params["w3"])
        kernel = _critic_kernel_discrete

    s_dim = state_in.shape[1]
    a_dim = act_in.shape[1]
    weight_bytes = sum(int(w.size) * w.dtype.itemsize for w in weights)

    budget, vmem_limit = _vmem_budget()
    tb_max = (_auto_block_batch(s_dim, a_dim, half, hidden, weight_bytes, budget)
              if block_batch is None else max(int(block_batch), 8))
    tb, b_pad = _choose_tile(batch, tb_max)
    if b_pad != batch:                 # only when no dividing tile exists
        state_in = jnp.pad(state_in, ((0, b_pad - batch), (0, 0)))
        act_in = jnp.pad(act_in, ((0, b_pad - batch), (0, 0)))
    grid = (b_pad // tb,)

    in_specs = (
        [pl.BlockSpec((tb, s_dim), lambda i: (i, 0)),
         pl.BlockSpec((tb, a_dim), lambda i: (i, 0))]
        + [_pinned(w) for w in weights]
        + [pl.BlockSpec(memory_space=pltpu.MemorySpace.SMEM)]     # b3 scalar
    )
    # Lane-dense output: one (1, 1, tb) row per grid step.
    out_specs = pl.BlockSpec((1, 1, tb), lambda i: (i, 0, 0))

    out = pl.pallas_call(
        kernel,
        out_shape=jax.ShapeDtypeStruct((grid[0], 1, tb), f32),
        grid=grid,
        in_specs=in_specs,
        out_specs=out_specs,
        compiler_params=pltpu.CompilerParams(
            dimension_semantics=("parallel",),
            vmem_limit_bytes=int(vmem_limit)),
    )(state_in, act_in, *weights, params["b3"])

    return out.reshape(-1)[:batch].reshape(batch, 1)


# ----------------------------------------------------------------------------
# Parameters
# ----------------------------------------------------------------------------
def init_params(key, state_dim, action_dim, hidden_dim, continuous=True):
    """Random f32 parameters, weights stored [in, out] (transposed vs. PyTorch)."""
    half = hidden_dim // 2
    ks = jax.random.split(key, 5)

    def lin(k, fan_in, fan_out):
        w = jax.random.normal(k, (fan_in, fan_out), jnp.float32) * 0.1
        b = jnp.full((1, fan_out), 0.01, jnp.float32)
        return w, b

    ws, bs = lin(ks[0], state_dim, half)
    if continuous:
        wa, ba = lin(ks[1], action_dim, half)
    else:
        wa = jax.random.normal(ks[1], (action_dim, half), jnp.float32) * 0.1
        ba = jnp.zeros((1, half), jnp.float32)
    w1, b1 = lin(ks[2], hidden_dim, hidden_dim)
    w2, b2 = lin(ks[3], hidden_dim, hidden_dim)
    w3, b3 = lin(ks[4], hidden_dim, 1)
    return dict(ws=ws, bs=bs, wa=wa, ba=ba, w1=w1, b1=b1,
                w2=w2, b2=b2, w3=w3, b3=b3)


def prepare_params(raw, continuous=True, compute_dtype=jnp.bfloat16):
    """One-time weight preparation (bf16 casts, W1 pre-split for the folded
    concat, head pre-reshaped) so the forward pass does zero weight plumbing."""
    f32 = jnp.float32
    half = raw["ws"].shape[1]
    hidden = raw["w1"].shape[1]
    if raw["w1"].shape[0] != 2 * half:
        raise ValueError("hidden_dim must equal 2 * (hidden_dim // 2); got "
                         f"w1 in-dim {raw['w1'].shape[0]} vs half {half}")
    p = dict(
        ws=raw["ws"].astype(compute_dtype),
        bs=raw["bs"].reshape(1, half).astype(f32),
        w1s=raw["w1"][:half].astype(compute_dtype),
        w1a=raw["w1"][half:].astype(compute_dtype),
        b1=raw["b1"].reshape(1, hidden).astype(f32),
        w2=raw["w2"].astype(compute_dtype),
        b2=raw["b2"].reshape(1, hidden).astype(f32),
        w3=raw["w3"].reshape(1, hidden).astype(compute_dtype),
        b3=raw["b3"].reshape(1, 1).astype(f32),
    )
    if continuous:
        p["wa"] = raw["wa"].astype(compute_dtype)
        p["ba"] = raw["ba"].reshape(1, half).astype(f32)
    else:
        p["wa_embed"] = raw["wa"].astype(f32)    # embedding table (gathered)
    return p


# ----------------------------------------------------------------------------
# Pure-JAX reference (mirrors the kernel's mixed precision)
# ----------------------------------------------------------------------------
def _reference_forward(state, action, raw, continuous=True,
                       compute_dtype=jnp.bfloat16):
    f32 = jnp.float32
    relu = lambda x: jnp.maximum(x, 0.0)
    dot = lambda a, b: jnp.dot(a.astype(compute_dtype), b.astype(compute_dtype),
                               preferred_element_type=f32)
    half = raw["ws"].shape[1]
    batch = state.shape[0]
    sf = relu(dot(state, raw["ws"]) + raw["bs"])
    if continuous:
        af = relu(dot(action.reshape(batch, -1), raw["wa"]) + raw["ba"])
    else:
        idx = action.reshape(batch).astype(jnp.int32)
        af = relu(raw["wa"][idx])
    h = relu(dot(sf, raw["w1"][:half]) + dot(af, raw["w1"][half:]) + raw["b1"])
    h = relu(dot(h, raw["w2"]) + raw["b2"])
    return dot(h, raw["w3"]) + raw["b3"]


if __name__ == "__main__":
    key = jax.random.PRNGKey(0)
    k_s, k_a, k_p, k_p2, k_ad = jax.random.split(key, 5)

    batch, state_dim, hidden_dim = 64, 16, 32

    # --- continuous-action critic (nn.Linear action encoder) ----------------
    action_dim = 4
    state = jax.random.normal(k_s, (batch, state_dim), jnp.float32)
    action = jax.random.normal(k_a, (batch, action_dim), jnp.float32)
    raw = init_params(k_p, state_dim, action_dim, hidden_dim, continuous=True)
    params = prepare_params(raw, continuous=True)

    value = mlp_critic_forward(state, action, params, continuous=True,
                               block_batch=32)        # 2 grid steps -> pipelined
    value = jax.block_until_ready(value)
    ref = _reference_forward(state, action, raw, continuous=True)
    assert value.shape == (batch, 1)
    assert jnp.allclose(value, ref, atol=2e-3, rtol=2e-3), \
        float(jnp.max(jnp.abs(value - ref)))

    # auto-tiled path (generation-aware VMEM budget; single grid step here)
    value_auto = jax.block_until_ready(
        mlp_critic_forward(state, action, params, continuous=True))
    assert jnp.allclose(value_auto, ref, atol=2e-3, rtol=2e-3)

    # --- discrete-action critic (nn.Embedding action encoder) ---------------
    n_actions = 10
    raw_d = init_params(k_p2, state_dim, n_actions, hidden_dim, continuous=False)
    params_d = prepare_params(raw_d, continuous=False)
    action_d = jax.random.randint(k_ad, (batch,), 0, n_actions)

    value_d = mlp_critic_forward(state, action_d, params_d, continuous=False,
                                 block_batch=32)
    value_d = jax.block_until_ready(value_d)
    ref_d = _reference_forward(state, action_d, raw_d, continuous=False)
    assert value_d.shape == (batch, 1)
    assert jnp.allclose(value_d, ref_d, atol=2e-3, rtol=2e-3), \
        float(jnp.max(jnp.abs(value_d - ref_d)))

    print("KERNEL_OK")
</pallas_src>

<mosaic_0001>
module attributes {stable_mosaic.version = 11 : i64} {
  func.func @_critic_kernel_continuous(%arg0: i32, %arg1: memref<32x16xf32, #tpu.memory_space<vmem>>, %arg2: memref<32x4xf32, #tpu.memory_space<vmem>>, %arg3: memref<16x16xbf16, #tpu.memory_space<vmem>>, %arg4: memref<1x16xf32, #tpu.memory_space<vmem>>, %arg5: memref<4x16xbf16, #tpu.memory_space<vmem>>, %arg6: memref<1x16xf32, #tpu.memory_space<vmem>>, %arg7: memref<16x32xbf16, #tpu.memory_space<vmem>>, %arg8: memref<16x32xbf16, #tpu.memory_space<vmem>>, %arg9: memref<1x32xf32, #tpu.memory_space<vmem>>, %arg10: memref<32x32xbf16, #tpu.memory_space<vmem>>, %arg11: memref<1x32xf32, #tpu.memory_space<vmem>>, %arg12: memref<1x32xbf16, #tpu.memory_space<vmem>>, %arg13: memref<1x1xf32, #tpu.memory_space<smem>>, %arg14: memref<1x1x32xf32, #tpu.memory_space<vmem>>) attributes {dimension_semantics = [#tpu.dimension_semantics<parallel>], iteration_bounds = array<i64: 2>, scalar_prefetch = 0 : i64, scratch_operands = 0 : i64, tpu.core_type = #tpu.core_type<tc>, window_params = [{transform_indices = @transform_0, window_bounds = array<i64: 32, 16>}, {transform_indices = @transform_1, window_bounds = array<i64: 32, 4>}, {pipeline_mode = #tpu.pipeline_mode<synchronous>, transform_indices = @transform_2, window_bounds = array<i64: 16, 16>}, {pipeline_mode = #tpu.pipeline_mode<synchronous>, transform_indices = @transform_3, window_bounds = array<i64: 1, 16>}, {pipeline_mode = #tpu.pipeline_mode<synchronous>, transform_indices = @transform_4, window_bounds = array<i64: 4, 16>}, {pipeline_mode = #tpu.pipeline_mode<synchronous>, transform_indices = @transform_5, window_bounds = array<i64: 1, 16>}, {pipeline_mode = #tpu.pipeline_mode<synchronous>, transform_indices = @transform_6, window_bounds = array<i64: 16, 32>}, {pipeline_mode = #tpu.pipeline_mode<synchronous>, transform_indices = @transform_7, window_bounds = array<i64: 16, 32>}, {pipeline_mode = #tpu.pipeline_mode<synchronous>, transform_indices = @transform_8, window_bounds = array<i64: 1, 32>}, {pipeline_mode = #tpu.pipeline_mode<synchronous>, transform_indices = @transform_9, window_bounds = array<i64: 32, 32>}, {pipeline_mode = #tpu.pipeline_mode<synchronous>, transform_indices = @transform_10, window_bounds = array<i64: 1, 32>}, {pipeline_mode = #tpu.pipeline_mode<synchronous>, transform_indices = @transform_11, window_bounds = array<i64: 1, 32>}, {transform_indices = @transform_12, window_bounds = array<i64: 1, 1>}, {transform_indices = @transform_13, window_bounds = array<i64: 1, 1, 32>}]} {
    %c0 = arith.constant 0 : index
    %c0_0 = arith.constant 0 : index
    %0 = vector.load %arg1[%c0, %c0_0] : memref<32x16xf32, #tpu.memory_space<vmem>>, vector<32x16xf32>
    %c0_1 = arith.constant 0 : index
    %c0_2 = arith.constant 0 : index
    %1 = vector.load %arg3[%c0_1, %c0_2] : memref<16x16xbf16, #tpu.memory_space<vmem>>, vector<16x16xbf16>
    %c0_3 = arith.constant 0 : index
    %c0_4 = arith.constant 0 : index
    %2 = vector.load %arg4[%c0_3, %c0_4] : memref<1x16xf32, #tpu.memory_space<vmem>>, vector<1x16xf32>
    %3 = arith.truncf %0 : vector<32x16xf32> to vector<32x16xbf16>
    %cst = arith.constant dense<0.000000e+00> : vector<32x16xf32>
    %4 = tpu.matmul %3, %1, %cst {dimension_numbers = #tpu.dot_dimension_numbers<[1], [0], [0], [1], [0, 0, 1, 1], [], []>} : vector<32x16xbf16>, vector<16x16xbf16>, vector<32x16xf32> -> vector<32x16xf32>
    %5 = vector.broadcast %2 : vector<1x16xf32> to vector<32x16xf32>
    %6 = arith.addf %4, %5 : vector<32x16xf32>
    %cst_5 = arith.constant 0.000000e+00 : f32
    %7 = vector.broadcast %cst_5 : f32 to vector<32x16xf32>
    %8 = arith.maximumf %6, %7 : vector<32x16xf32>
    %9 = arith.truncf %8 : vector<32x16xf32> to vector<32x16xbf16>
    %c0_6 = arith.constant 0 : index
    %c0_7 = arith.constant 0 : index
    %10 = vector.load %arg2[%c0_6, %c0_7] : memref<32x4xf32, #tpu.memory_space<vmem>>, vector<32x4xf32>
    %c0_8 = arith.constant 0 : index
    %c0_9 = arith.constant 0 : index
    %11 = vector.load %arg5[%c0_8, %c0_9] : memref<4x16xbf16, #tpu.memory_space<vmem>>, vector<4x16xbf16>
    %c0_10 = arith.constant 0 : index
    %c0_11 = arith.constant 0 : index
    %12 = vector.load %arg6[%c0_10, %c0_11] : memref<1x16xf32, #tpu.memory_space<vmem>>, vector<1x16xf32>
    %13 = arith.truncf %10 : vector<32x4xf32> to vector<32x4xbf16>
    %cst_12 = arith.constant dense<0.000000e+00> : vector<32x16xf32>
    %14 = tpu.matmul %13, %11, %cst_12 {dimension_numbers = #tpu.dot_dimension_numbers<[1], [0], [0], [1], [0, 0, 1, 1], [], []>} : vector<32x4xbf16>, vector<4x16xbf16>, vector<32x16xf32> -> vector<32x16xf32>
    %15 = vector.broadcast %12 : vector<1x16xf32> to vector<32x16xf32>
    %16 = arith.addf %14, %15 : vector<32x16xf32>
    %cst_13 = arith.constant 0.000000e+00 : f32
    %17 = vector.broadcast %cst_13 : f32 to vector<32x16xf32>
    %18 = arith.maximumf %16, %17 : vector<32x16xf32>
    %19 = arith.truncf %18 : vector<32x16xf32> to vector<32x16xbf16>
    %c0_14 = arith.constant 0 : index
    %c0_15 = arith.constant 0 : index
    %20 = vector.load %arg7[%c0_14, %c0_15] : memref<16x32xbf16, #tpu.memory_space<vmem>>, vector<16x32xbf16>
    %cst_16 = arith.constant dense<0.000000e+00> : vector<32x32xf32>
    %21 = tpu.matmul %9, %20, %cst_16 {dimension_numbers = #tpu.dot_dimension_numbers<[1], [0], [0], [1], [0, 0, 1, 1], [], []>} : vector<32x16xbf16>, vector<16x32xbf16>, vector<32x32xf32> -> vector<32x32xf32>
    %c0_17 = arith.constant 0 : index
    %c0_18 = arith.constant 0 : index
    %22 = vector.load %arg8[%c0_17, %c0_18] : memref<16x32xbf16, #tpu.memory_space<vmem>>, vector<16x32xbf16>
    %cst_19 = arith.constant dense<0.000000e+00> : vector<32x32xf32>
    %23 = tpu.matmul %19, %22, %cst_19 {dimension_numbers = #tpu.dot_dimension_numbers<[1], [0], [0], [1], [0, 0, 1, 1], [], []>} : vector<32x16xbf16>, vector<16x32xbf16>, vector<32x32xf32> -> vector<32x32xf32>
    %24 = arith.addf %21, %23 : vector<32x32xf32>
    %c0_20 = arith.constant 0 : index
    %c0_21 = arith.constant 0 : index
    %25 = vector.load %arg9[%c0_20, %c0_21] : memref<1x32xf32, #tpu.memory_space<vmem>>, vector<1x32xf32>
    %26 = vector.broadcast %25 : vector<1x32xf32> to vector<32x32xf32>
    %27 = arith.addf %24, %26 : vector<32x32xf32>
    %cst_22 = arith.constant 0.000000e+00 : f32
    %28 = vector.broadcast %cst_22 : f32 to vector<32x32xf32>
    %29 = arith.maximumf %27, %28 : vector<32x32xf32>
    %30 = arith.truncf %29 : vector<32x32xf32> to vector<32x32xbf16>
    %c0_23 = arith.constant 0 : index
    %c0_24 = arith.constant 0 : index
    %31 = vector.load %arg10[%c0_23, %c0_24] : memref<32x32xbf16, #tpu.memory_space<vmem>>, vector<32x32xbf16>
    %cst_25 = arith.constant dense<0.000000e+00> : vector<32x32xf32>
    %32 = tpu.matmul %30, %31, %cst_25 {dimension_numbers = #tpu.dot_dimension_numbers<[1], [0], [0], [1], [0, 0, 1, 1], [], []>} : vector<32x32xbf16>, vector<32x32xbf16>, vector<32x32xf32> -> vector<32x32xf32>
    %c0_26 = arith.constant 0 : index
    %c0_27 = arith.constant 0 : index
    %33 = vector.load %arg11[%c0_26, %c0_27] : memref<1x32xf32, #tpu.memory_space<vmem>>, vector<1x32xf32>
    %34 = vector.broadcast %33 : vector<1x32xf32> to vector<32x32xf32>
    %35 = arith.addf %32, %34 : vector<32x32xf32>
    %cst_28 = arith.constant 0.000000e+00 : f32
    %36 = vector.broadcast %cst_28 : f32 to vector<32x32xf32>
    %37 = arith.maximumf %35, %36 : vector<32x32xf32>
    %38 = arith.truncf %37 : vector<32x32xf32> to vector<32x32xbf16>
    %c0_29 = arith.constant 0 : index
    %c0_30 = arith.constant 0 : index
    %39 = vector.load %arg12[%c0_29, %c0_30] : memref<1x32xbf16, #tpu.memory_space<vmem>>, vector<1x32xbf16>
    "tpu.trace_start"() <{level = 10 : i32, message = "oh,bh->ob"}> : () -> ()
    %cst_31 = arith.constant dense<0.000000e+00> : vector<1x32xf32>
    %40 = tpu.matmul %39, %38, %cst_31 {dimension_numbers = #tpu.dot_dimension_numbers<[1], [1], [0], [0], [0, 0, 1, 0], [], []>} : vector<1x32xbf16>, vector<32x32xbf16>, vector<1x32xf32> -> vector<1x32xf32>
    "tpu.trace_stop"() : () -> ()
    %c0_32 = arith.constant 0 : index
    %c0_33 = arith.constant 0 : index
    %41 = memref.load %arg13[%c0_32, %c0_33] : memref<1x1xf32, #tpu.memory_space<smem>>
    %42 = vector.broadcast %41 : f32 to vector<1x32xf32>
    %43 = arith.addf %40, %42 : vector<1x32xf32>
    %44 = vector.shape_cast %43 : vector<1x32xf32> to vector<1x1x32xf32>
    %c0_34 = arith.constant 0 : index
    %c0_35 = arith.constant 0 : index
    %c0_36 = arith.constant 0 : index
    %45 = vector.load %arg14[%c0_34, %c0_35, %c0_36] : memref<1x1x32xf32, #tpu.memory_space<vmem>>, vector<1x1x32xf32>
    tpu.vector_store %arg14[%c0_34, %c0_35, %c0_36], %44 {strides = array<i32>} : memref<1x1x32xf32, #tpu.memory_space<vmem>>, vector<1x1x32xf32>,
    return
  }
  func.func @transform_0(%arg0: i32) -> (i32, i32) {
    %c0_i32 = arith.constant 0 : i32
    %c0_i32_0 = arith.constant 0 : i32
    return %arg0, %c0_i32 : i32, i32
  }
  func.func @transform_1(%arg0: i32) -> (i32, i32) {
    %c0_i32 = arith.constant 0 : i32
    %c0_i32_0 = arith.constant 0 : i32
    return %arg0, %c0_i32 : i32, i32
  }
  func.func @transform_2(%arg0: i32) -> (i32, i32) {
    %c0_i32 = arith.constant 0 : i32
    %c0_i32_0 = arith.constant 0 : i32
    %c0_i32_1 = arith.constant 0 : i32
    return %c0_i32, %c0_i32_0 : i32, i32
  }
  func.func @transform_3(%arg0: i32) -> (i32, i32) {
    %c0_i32 = arith.constant 0 : i32
    %c0_i32_0 = arith.constant 0 : i32
    %c0_i32_1 = arith.constant 0 : i32
    return %c0_i32, %c0_i32_0 : i32, i32
  }
  func.func @transform_4(%arg0: i32) -> (i32, i32) {
    %c0_i32 = arith.constant 0 : i32
    %c0_i32_0 = arith.constant 0 : i32
    %c0_i32_1 = arith.constant 0 : i32
    return %c0_i32, %c0_i32_0 : i32, i32
  }
  func.func @transform_5(%arg0: i32) -> (i32, i32) {
    %c0_i32 = arith.constant 0 : i32
    %c0_i32_0 = arith.constant 0 : i32
    %c0_i32_1 = arith.constant 0 : i32
    return %c0_i32, %c0_i32_0 : i32, i32
  }
  func.func @transform_6(%arg0: i32) -> (i32, i32) {
    %c0_i32 = arith.constant 0 : i32
    %c0_i32_0 = arith.constant 0 : i32
    %c0_i32_1 = arith.constant 0 : i32
    return %c0_i32, %c0_i32_0 : i32, i32
  }
  func.func @transform_7(%arg0: i32) -> (i32, i32) {
    %c0_i32 = arith.constant 0 : i32
    %c0_i32_0 = arith.constant 0 : i32
    %c0_i32_1 = arith.constant 0 : i32
    return %c0_i32, %c0_i32_0 : i32, i32
  }
  func.func @transform_8(%arg0: i32) -> (i32, i32) {
    %c0_i32 = arith.constant 0 : i32
    %c0_i32_0 = arith.constant 0 : i32
    %c0_i32_1 = arith.constant 0 : i32
    return %c0_i32, %c0_i32_0 : i32, i32
  }
  func.func @transform_9(%arg0: i32) -> (i32, i32) {
    %c0_i32 = arith.constant 0 : i32
    %c0_i32_0 = arith.constant 0 : i32
    %c0_i32_1 = arith.constant 0 : i32
    return %c0_i32, %c0_i32_0 : i32, i32
  }
  func.func @transform_10(%arg0: i32) -> (i32, i32) {
    %c0_i32 = arith.constant 0 : i32
    %c0_i32_0 = arith.constant 0 : i32
    %c0_i32_1 = arith.constant 0 : i32
    return %c0_i32, %c0_i32_0 : i32, i32
  }
  func.func @transform_11(%arg0: i32) -> (i32, i32) {
    %c0_i32 = arith.constant 0 : i32
    %c0_i32_0 = arith.constant 0 : i32
    %c0_i32_1 = arith.constant 0 : i32
    return %c0_i32, %c0_i32_0 : i32, i32
  }
  func.func @transform_12(%arg0: i32) -> (i32, i32) {
    %c0_i32 = arith.constant 0 : i32
    %c0_i32_0 = arith.constant 0 : i32
    %c0_i32_1 = arith.constant 0 : i32
    return %c0_i32, %c0_i32_0 : i32, i32
  }
  func.func @transform_13(%arg0: i32) -> (i32, i32, i32) {
    %c0_i32 = arith.constant 0 : i32
    %c0_i32_0 = arith.constant 0 : i32
    %c0_i32_1 = arith.constant 0 : i32
    return %arg0, %c0_i32, %c0_i32_0 : i32, i32, i32
  }
}

</mosaic_0001>

<bundles_post_ra>
// kernel: mlp_critic_forward.1
= control target key start
LH: loop header
LB: loop body
LE: loop exit
PB: predicated region body
PF: predicated region fallthrough
CT: control target
= control target key end

     0   :  { %s1160_s27 = smov 0   ;;  %s1229_s0 = inlined_call_operand.vmem [shape: f32[64,16], index: 0, kind: input, shape index: {}]   ;;  %s1230_s1 = inlined_call_operand.vmem [shape: f32[64,4], index: 1, kind: input, shape index: {}]   ;;  %s1231_s2 = inlined_call_operand.vmem [shape: bf16[16,16], index: 2, kind: input, shape index: {}]   ;;  %s1232_s3 = inlined_call_operand.vmem [shape: f32[1,16], index: 3, kind: input, shape index: {}]   ;;  %s1233_s4 = inlined_call_operand.vmem [shape: bf16[4,16], index: 4, kind: input, shape index: {}]   ;;  %s1234_s5 = inlined_call_operand.vmem [shape: f32[1,16], index: 5, kind: input, shape index: {}]   ;;  %s1235_s6 = inlined_call_operand.vmem [shape: bf16[16,32], index: 6, kind: input, shape index: {}]   ;;  %s1236_s7 = inlined_call_operand.vmem [shape: bf16[16,32], index: 7, kind: input, shape index: {}]   ;;  %s1237_s8 = inlined_call_operand.vmem [shape: f32[1,32], index: 8, kind: input, shape index: {}]   ;;  %s1238_s9 = inlined_call_operand.vmem [shape: bf16[32,32], index: 9, kind: input, shape index: {}]   ;;  %s1239_s10 = inlined_call_operand.vmem [shape: f32[1,32], index: 10, kind: input, shape index: {}]   ;;  %s1240_s11 = inlined_call_operand.vmem [shape: bf16[1,32], index: 11, kind: input, shape index: {}]   ;;  %s1241_s12 = inlined_call_operand.<no memory space> [shape: f32[1,1], index: 12, kind: input, shape index: {}]   ;;  %s1242_s13 = inlined_call_operand.vmem [shape: f32[2,1,32], index: 13, kind: output, shape index: {}]  }
   0x1   :  { %18 = sst [smem:[#allocation2]] %s1241_s12 }
   0x2 LB: > { %s1166_s28 = sadd.s32 4294967295, %s1083_s27   ;;  %p971_p0 = scmp.ge.s32.totalorder %s1083_s27, 1  ;;  %s1083_s27 = sphi %s1160_s27, %s24_s27  }
   0x3   : > { %p400_p1 = scmp.lt.s32.totalorder %s1083_s27, 3 }
   0x5   : > { %p401_p2 = pnand %p971_p0, %p400_p1 }
   0x6   : > { %v550_v0 = vld [vmem:[%s1233_s4] sm:$0x3] (!%p401_p2)  ;;  %vm567_vm0 = vcmask (!%p401_p2), 1041408   ;;  %s972_s12 = sshll.u32 (!%p401_p2), %s1166_s28, 2  ;;  %vm560_vm1 = vcmask (!%p401_p2), 31744   ;;  %vm484_vm2 = vcmask (!%p401_p2), 130048  }
   0x7   : > { %404 = sbr.rel (%p401_p2) target bundleno = 929 (0x3a1), region = 72  ;;  %v1072_v1 = vld [vmem:[%s1231_s2] sm:$0xff] (!%p401_p2)   ;;  %1061 = vmatprep.subr.msk.bf16.mxu1 (!%p401_p2), %vm567_vm0, %v550_v0  ;;  %v569_v2 = vsel (!%p401_p2), %vm567_vm0, %v550_v0, 0  ;;  %p448_p3 = scmp.lt.s32.totalorder (!%p401_p2), %s972_s12, 7  ;;  %v1076_v48 = vld [vmem:[%s1238_s9 + $0x8] sm:$0xff] (!%p401_p2)   ;;  %vm792_vm3 = vcmask (!%p401_p2), 261120  }
   0x8   : > { %1024 = vmatpush3.bf16.msra.mxu1 (!%p401_p2), %v569_v2  ;;  %1017 = vmatprep.subr.bf16.mxu0 (!%p401_p2), %v1072_v1  ;;  %v1073_v15 = vld [vmem:[%s1236_s7] sm:$0xff] (!%p401_p2)   ;;  %v1085_v0 = vmov (!%p401_p2), 0.0   ;;  %vm1086_vm4 = vmmov (!%p401_p2), 0   ;;  %s855_s25 = sld [smem:[#allocation2]] (!%p401_p2)  ;;  %p459_p4 = scmp.lt.s32.totalorder (!%p401_p2), %s1166_s28, 1  ;;  %vm906_vm5 = vcmask (!%p401_p2), 253952  }
   0x9   : > { %1018 = vmatpush3.bf16.msra.mxu0 (!%p401_p2), %v1072_v1  ;;  %v1074_v16 = vld [vmem:[%s1235_s6] sm:$0xff] (!%p401_p2)  }
   0xa   : > { %1029 = vmatprep.subr.bf16.mxu0 (!%p401_p2), %v1073_v15  ;;  %v980_v17 = vld [vmem:[%s1234_s5] ss:$0 sm:$0xff] (!%p401_p2) }
   0xb   : > { %v976_v18 = vld [vmem:[%s1232_s3] ss:$0 sm:$0xff] (!%p401_p2) }
   0xc   : > { %v1075_v47 = vld [vmem:[%s1238_s9] sm:$0xff] (!%p401_p2)  }
   0xd   : > { %1041 = vmatprep.subr.bf16.mxu1 (!%p401_p2), %v1075_v47  ;;  %v989_v49 = vld [vmem:[%s1237_s8] ss:$0 sm:$0xff] (!%p401_p2) }
   0xe   : > { %s1244_s12 = smov (!%p448_p3, %s972_s12), 7  ;;  %v990_v1 = vld [vmem:[%s1239_s10] ss:$0 sm:$0xff]  ;;  %s1246_s28 = smov (!%p459_p4, %s1166_s28), 1 }
   0xf   : > { %s973_s16 = sshll.u32 %s1244_s12, 3  ;;  %s461_s30 = scalar_lea.vmem %s1242_s13, %s1246_s28 }
  0x10   : > { %s457_s19 = scalar_lea.vmem %s1230_s1, %s973_s16  ;;  %s451_s22 = scalar_lea.vmem %s1229_s0, %s973_s16 }
  0x11   : > { %v546_v3 = vld [vmem:[%s457_s19] sm:$0xff]  ;;  %v547_v4 = vld [vmem:[%s457_s19 + $0x8] sm:$0xff]  ;;  %v548_v5 = vld [vmem:[%s457_s19 + $0x10] sm:$0xff] }
  0x12   : > { %v552_v6 = vpack.c.bf16 %v547_v4, %v546_v3  ;;  %v549_v7 = vld [vmem:[%s457_s19 + $0x18] sm:$0xff]  ;;  %v463_v8 = vld [vmem:[%s451_s22] sm:$0xff]  ;;  %v464_v9 = vld [vmem:[%s451_s22 + $0x8] sm:$0xff] }
  0x13   : > { %v553_v10 = vpack.c.bf16 %v549_v7, %v548_v5  ;;  %v470_v11 = vpack.c.bf16 %v464_v9, %v463_v8  ;;  %v465_v12 = vld [vmem:[%s451_s22 + $0x10] sm:$0xff]  ;;  %v466_v13 = vld [vmem:[%s451_s22 + $0x18] sm:$0xff] }
  0x14   : > { %1025 = vmatprep.mubr.msk.bf16.mxu1 %vm560_vm1, %v552_v6  ;;  %v471_v14 = vpack.c.bf16 %v466_v13, %v465_v12 }
  0x15   : > { %1026 = vmatmul.mubr.msk.bf16.vlgmr.msra.gmra.mrb[0].mxu1 %vm560_vm1, %v553_v10  ;;  %1019 = vmatprep.mubr.msk.bf16.mxu0 %vm484_vm2, %v470_v11 }
  0x16   : > { %1020 = vmatmul.mubr.msk.bf16.vlgmr.msra.gmra.mrb[0].mxu0 %vm484_vm2, %v471_v14  ;;  %1042 = vmatpush3.bf16.msra.mxu1 %v1075_v47 }
  0x17   : > { %1030 = vmatpush3.bf16.msra.mxu0 %v1073_v15  ;;  %1043 = vmatprep.subr.bf16.mxu1 %v1076_v48 }
  0x18   : > { %1035 = vmatprep.subr.bf16.mxu0 %v1074_v16 }
  0x1a   : > { %1044 = vmatpush3.bf16.msra.mxu1 %v1076_v48 }
  0x1b   : > { %1049 = vmatprep.subr.bf16.mxu1 %v1085_v0 }
  0xe8   : > { %v1027_v19 = vpop.f32.mrb[0].mxu1 }
  0xe9   : > { %v614_v20 = vadd.f32 %v1027_v19, %v980_v17  ;;  %v605_v21 = vpop.f32.mrb[1].mxu1  ;;  %v1021_v22 = vpop.f32.mrb[0].mxu0  ;;  %v856_v19 = vstv %s855_s25 }
  0xea   : > { %v606_v23 = vadd.f32 %v980_v17, %v605_v21  ;;  %v1028_v24 = vpop.f32.mrb[2].mxu1  ;;  %v534_v25 = vadd.f32 %v1021_v22, %v976_v18  ;;  %v525_v26 = vpop.f32.mrb[1].mxu0 }
  0xeb   : > { %v617_v27 = vadd.f32 %v1028_v24, %v980_v17  ;;  %v608_v28 = vpop.f32.mrb[3].mxu1  ;;  %v526_v29 = vadd.f32 %v976_v18, %v525_v26  ;;  %v1022_v30 = vpop.f32.mrb[2].mxu0  ;;  %v622_v35 = vmax.f32 %v614_v20, 0.0 }
  0xec   : > { %v609_v31 = vadd.f32 %v980_v17, %v608_v28  ;;  %v542_v32 = vmax.f32 %v534_v25, 0.0  ;;  %v537_v33 = vadd.f32 %v1022_v30, %v976_v18  ;;  %v528_v34 = vpop.f32.mrb[3].mxu0  ;;  %v620_v39 = vmax.f32 %v606_v23, 0.0 }
  0xed   : > { %v623_v36 = vmax.f32 %v617_v27, 0.0  ;;  %v540_v37 = vmax.f32 %v526_v29, 0.0  ;;  %v529_v38 = vadd.f32 %v976_v18, %v528_v34  ;;  %v854_v18 = vld [vmem:[%s1240_s11] sm:$0x1] }
  0xee   : > { %v621_v40 = vmax.f32 %v609_v31, 0.0  ;;  %v543_v41 = vmax.f32 %v537_v33, 0.0 }
  0xef   : > { %v625_v42 = vpack.c.bf16 %v623_v36, %v622_v35  ;;  %v541_v43 = vmax.f32 %v529_v38, 0.0 }
  0xf0   : > { %v624_v44 = vpack.c.bf16 %v621_v40, %v620_v39  ;;  %v545_v45 = vpack.c.bf16 %v543_v41, %v542_v32 }
  0xf1   : > { %v544_v46 = vpack.c.bf16 %v541_v43, %v540_v37 }
  0xf2   : > { %1031 = vmatprep.mubr.msk.bf16.mxu0 %vm484_vm2, %v624_v44 }
  0xf3   : > { %1032 = vmatmul.mubr.msk.bf16.vlgmr.msra.gmra.mrb[4].mxu0 %vm484_vm2, %v625_v42 }
  0xf4   : > { %1036 = vmatpush3.bf16.msra.mxu0 %v1074_v16  ;;  %1037 = vmatprep.mubr.msk.bf16.mxu0 %vm484_vm2, %v544_v46 }
  0xff   : > { %1038 = vmatmul.mubr.msk.bf16.vlgmr.msra.gmra.mrb[4].mxu0 %vm484_vm2, %v545_v45 }
 0x1d2   : > { %v1039_v50 = vpop.f32.mrb[4].mxu0 }
 0x1d3   : > { %v761_v51 = vadd.f32 %v1039_v50, %v989_v49  ;;  %v737_v52 = vpop.f32.mrb[5].mxu0 }
 0x1d4   : > { %v759_v53 = vadd.f32 %v989_v49, %v737_v52  ;;  %v1040_v54 = vpop.f32.mrb[6].mxu0 }
 0x1d5   : > { %v762_v55 = vadd.f32 %v1040_v54, %v989_v49  ;;  %v740_v56 = vpop.f32.mrb[7].mxu0  ;;  %v765_v58 = vmax.f32 %v761_v51, 0.0 }
 0x1d6   : > { %v760_v57 = vadd.f32 %v989_v49, %v740_v56  ;;  %v763_v60 = vmax.f32 %v759_v53, 0.0 }
 0x1d7   : > { %v766_v59 = vmax.f32 %v762_v55, 0.0 }
 0x1d8   : > { %v764_v61 = vmax.f32 %v760_v57, 0.0 }
 0x1d9   : > { %v768_v62 = vpack.c.bf16 %v766_v59, %v765_v58 }
 0x1da   : > { %v767_v63 = vpack.c.bf16 %v764_v61, %v763_v60 }
 0x1dc   : > { %1045 = vmatprep.mubr.msk.bf16.mxu1 %vm792_vm3, %v767_v63 }
 0x1dd   : > { %1046 = vmatmul.mubr.msk.bf16.vlgmr.msra.gmra.mrb[4].mxu1 %vm792_vm3, %v768_v62 }
 0x1de   : > { %1053 = vmatprep.mubr.msk.bf16.mxu1 %vm1086_vm4, %v1085_v0 }
 0x2b0   : > { %v1047_v2 = vpop.f32.mrb[4].mxu1 }
 0x2b1   : > { %v842_v3 = vadd.f32 %v1047_v2, %v990_v1  ;;  %v833_v4 = vpop.f32.mrb[5].mxu1 }
 0x2b2   : > { %v834_v5 = vadd.f32 %v990_v1, %v833_v4  ;;  %v1048_v6 = vpop.f32.mrb[6].mxu1 }
 0x2b3   : > { %v845_v7 = vadd.f32 %v1048_v6, %v990_v1  ;;  %v836_v8 = vpop.f32.mrb[7].mxu1  ;;  %v850_v10 = vmax.f32 %v842_v3, 0.0 }
 0x2b4   : > { %v837_v9 = vadd.f32 %v990_v1, %v836_v8  ;;  %v848_v12 = vmax.f32 %v834_v5, 0.0 }
 0x2b5   : > { %v851_v11 = vmax.f32 %v845_v7, 0.0 }
 0x2b6   : > { %v849_v13 = vmax.f32 %v837_v9, 0.0 }
 0x2b7   : > { %v853_v14 = vpack.c.bf16 %v851_v11, %v850_v10 }
 0x2b8   : > { %v852_v15 = vpack.c.bf16 %v849_v13, %v848_v12 }
 0x2b9   : > { %v864_v17 = vsel %vm792_vm3, %v853_v14, 0 }
 0x2ba   : > { %v861_v16 = vsel %vm792_vm3, %v852_v15, 0 }
 0x2bb   : > { %1050 = vmatpush3.bf16.xpose.msra.mxu1 %v861_v16 }
 0x2bc   : > { %1051 = vmatprep.subr.bf16.mxu1 %v1085_v0 }
 0x2c3   : > { %1052 = vmatpush3.bf16.xpose.msra.mxu1 %v864_v17 }
 0x2ca   : > { %1054 = vmatmul.mubr.msk.bf16.vlgmr.msra.gmra.mrb[8].mxu1 %vm792_vm3, %v854_v18 }
 0x39d   : > { %v900_v20 = vpop.f32.mrb[8].mxu1 }
 0x39e   : > { %v901_v21 = vadd.f32 %v900_v20, %v856_v19  ;;  %v1055_v22 = vpop.f32.mrb[9].mxu1 }
 0x39f   : > { %v903_v23 = vpop.f32.mrb[10].mxu1 }
 0x3a0   : > { %907 = vst.msk [vmem:[%s461_s30] sm:$0x1] %vm906_vm5, %v901_v21  ;;  %v1056_v24 = vpop.f32.mrb[11].mxu1 }
 0x3a1 PF: > { %s24_s27 = sadd.s32 1, %s1083_s27  }
 0x3a2   : > { %p21_p5 = scmp.ge.s32.totalorder %s24_s27, 4  }
 0x3a4   :  { %23 = sbr.rel (!%p21_p5) target bundleno = 2 (0x2), region = 105 }

</bundles_post_ra>
